<compile_context>
chip_gen: v7x
topology: tpu7x:2x2x1
jax: 0.10.0
libtpu: 0.0.40
codegen_flags: <defaults>
</compile_context>

<pallas_src>
import jax
import jax.numpy as jnp
from jax.experimental import pallas as pl
from jax.experimental.pallas import tpu as pltpu


def _round_up(x: int, m: int) -> int:
    return ((x + m - 1) // m) * m


# ----------------------------------------------------------------------------
# Kernels
# ----------------------------------------------------------------------------
def _cls_head_small_kernel(x_ref, w_ref, b_ref, o_ref):
    # Whole problem in one block: x (N, C) f32, w (C, NCpad) bf16,
    # b (1, NCpad) f32, o (N, NCpad) f32.
    o_ref[...] = (
        jnp.dot(x_ref[...].astype(jnp.bfloat16), w_ref[...],
                preferred_element_type=jnp.float32)
        + b_ref[...]
    )


def _cls_head_tiled_kernel(x_ref, w_ref, b_ref, o_ref):
    # x_ref: (tm, tk) f32   w_ref: (tk, tn) bf16
    # b_ref: (1, tn) f32    o_ref: (tm, tn) f32  (VMEM-resident across kk)
    kk = pl.program_id(2)

    @pl.when(kk == 0)
    def _():
        o_ref[...] = jnp.zeros_like(o_ref)

    o_ref[...] += jnp.dot(
        x_ref[...].astype(jnp.bfloat16), w_ref[...],
        preferred_element_type=jnp.float32,
    )

    @pl.when(kk == pl.num_programs(2) - 1)
    def _():
        # Bias add only in the epilogue; rides in a free VPU slot.
        o_ref[...] += b_ref[...]


# ----------------------------------------------------------------------------
# One-time parameter preparation (hoisted out of the per-call path)
# ----------------------------------------------------------------------------
def prepare_cls_head_params(weight, bias, *, small_weight_elems=128 * 1024):
    """Pad + cast the Linear parameters once at model init.

    weight : (in_features, num_classes) f32  (transpose of PyTorch fc.weight)
    bias   : (num_classes,) f32
    Returns a dict of device arrays plus static (Python int / str) config.
    """
    in_features, num_classes = weight.shape

    if in_features * num_classes <= small_weight_elems:
        # Tiny head: single full-block kernel. Only pad the class axis so the
        # output stores are lane-dense; no grid, no activation padding.
        nc_pad = _round_up(num_classes, 128)
        w_s = jnp.pad(weight, ((0, 0), (0, nc_pad - num_classes))).astype(
            jnp.bfloat16)
        b_s = jnp.pad(bias, (0, nc_pad - num_classes)).reshape(
            1, nc_pad).astype(jnp.float32)
        return dict(path="small", w=w_s, b=b_s,
                    in_features=in_features, num_classes=num_classes)

    # Tiled path tile sizes (class / reduction axes; M tile chosen per call).
    tk = min(_round_up(in_features, 128), 1024)   # reduction tile
    tn = min(_round_up(num_classes, 128), 512)    # class tile (lane-dense)
    c_pad = _round_up(in_features, tk)
    k_pad = _round_up(num_classes, tn)

    w_p = jnp.pad(
        weight, ((0, c_pad - in_features), (0, k_pad - num_classes))
    ).astype(jnp.bfloat16)
    b_p = jnp.pad(bias, (0, k_pad - num_classes)).reshape(1, k_pad).astype(
        jnp.float32)

    return dict(path="tiled", w=w_p, b=b_p,
                in_features=in_features, num_classes=num_classes,
                tk=tk, tn=tn, c_pad=c_pad, k_pad=k_pad)


# ----------------------------------------------------------------------------
# Forward
# ----------------------------------------------------------------------------
def _small_forward(x2, params):
    n = x2.shape[0]
    nc_pad = params["w"].shape[1]
    out = pl.pallas_call(
        _cls_head_small_kernel,
        out_shape=jax.ShapeDtypeStruct((n, nc_pad), jnp.float32),
    )(x2, params["w"], params["b"])
    return out[:, :params["num_classes"]]


def _tiled_forward(x2, params):
    n, in_features = x2.shape
    tk, tn = params["tk"], params["tn"]
    c_pad, k_pad = params["c_pad"], params["k_pad"]
    num_classes = params["num_classes"]

    # M tile: cover the whole (padded) batch up to 512 rows so W is streamed
    # from HBM exactly once (i-extent 1 for typical batches). With
    # tm<=512, tk<=1024, tn<=512 the double-buffered footprint is ~8-10 MiB,
    # comfortably inside the 32 MiB scoped VMEM limit on all generations.
    tm = min(_round_up(n, 8), 512)
    n_pad = _round_up(n, tm)

    # Skip the pad pass entirely when x is already tile-aligned.
    if (n_pad, c_pad) != (n, in_features):
        x_p = jnp.pad(x2, ((0, n_pad - n), (0, c_pad - in_features)))
    else:
        x_p = x2

    grid = (n_pad // tm, k_pad // tn, c_pad // tk)

    # Scheduling hint: count operand revisits (x re-read per class tile,
    # W/bias re-read per M tile) plus the output write.
    x_bytes = n_pad * c_pad * 4
    w_bytes = c_pad * k_pad * 2
    b_bytes = k_pad * 4
    o_bytes = n_pad * k_pad * 4
    cost = pl.CostEstimate(
        flops=2 * n_pad * c_pad * k_pad,
        transcendentals=0,
        bytes_accessed=(x_bytes * grid[1]
                        + (w_bytes + b_bytes) * grid[0]
                        + o_bytes),
    )

    out_padded = pl.pallas_call(
        _cls_head_tiled_kernel,
        out_shape=jax.ShapeDtypeStruct((n_pad, k_pad), jnp.float32),
        grid_spec=pltpu.PrefetchScalarGridSpec(
            num_scalar_prefetch=0,
            grid=grid,
            in_specs=[
                pl.BlockSpec((tm, tk), lambda i, j, kk: (i, kk)),   # x (f32)
                pl.BlockSpec((tk, tn), lambda i, j, kk: (kk, j)),   # W (bf16)
                pl.BlockSpec((1, tn), lambda i, j, kk: (0, j)),     # bias
            ],
            out_specs=pl.BlockSpec((tm, tn), lambda i, j, kk: (i, j)),
        ),
        compiler_params=pltpu.CompilerParams(
            dimension_semantics=("parallel", "parallel", "arbitrary"),
            vmem_limit_bytes=32 * 1024 * 1024,
        ),
        cost_estimate=cost,
    )(x_p, params["w"], params["b"])

    return out_padded[:n, :num_classes]


def cls_head_forward(x_nchw, params):
    """CLS_Head.forward for stages=1, dropout_ratio=0.

    x_nchw : (N, C, H, W) f32 with C*H*W == in_features
    params : output of prepare_cls_head_params (static config + device arrays)
    returns cls_score : (N, num_classes) f32
    """
    n = x_nchw.shape[0]
    x2 = x_nchw.reshape(n, -1)                 # == x.view(x.size(0), -1)
    assert x2.shape[1] == params["in_features"]
    if params["path"] == "small":
        return _small_forward(x2, params)
    return _tiled_forward(x2, params)


def _reference_forward(x_nchw, weight, bias):
    n = x_nchw.shape[0]
    return x_nchw.reshape(n, -1) @ weight + bias[None, :]


# ----------------------------------------------------------------------------
# Demo / correctness check
# ----------------------------------------------------------------------------
def _make_case(key, batch, in_channels, num_classes):
    kx, kw, kb = jax.random.split(key, 3)
    # nn.Linear default init: U(-1/sqrt(in_features), 1/sqrt(in_features)).
    bound = 1.0 / (in_channels ** 0.5)
    weight = jax.random.uniform(kw, (in_channels, num_classes), jnp.float32,
                                minval=-bound, maxval=bound)
    bias = jax.random.uniform(kb, (num_classes,), jnp.float32,
                              minval=-bound, maxval=bound)
    x = jax.random.normal(kx, (batch, in_channels, 1, 1), jnp.float32)
    return x, weight, bias


if __name__ == "__main__":
    key = jax.random.PRNGKey(0)
    k_small, k_tiled = jax.random.split(key, 2)

    # ---- Case 1: pooled features, tiny head -> single full-block path. ----
    batch, in_channels, num_classes = 8, 32, 81
    x, weight, bias = _make_case(k_small, batch, in_channels, num_classes)
    params = prepare_cls_head_params(weight, bias)
    out = jax.block_until_ready(cls_head_forward(x, params))
    ref = _reference_forward(x, weight, bias)
    assert params["path"] == "small"
    assert out.shape == (batch, num_classes)
    assert jnp.allclose(out, ref, atol=5e-2, rtol=5e-2), "small-path mismatch"

    # ---- Case 2: larger head -> tiled pipelined path (exercises padding). --
    batch, in_channels, num_classes = 50, 1000, 500
    x, weight, bias = _make_case(k_tiled, batch, in_channels, num_classes)
    params = prepare_cls_head_params(weight, bias)
    out = jax.block_until_ready(cls_head_forward(x, params))
    ref = _reference_forward(x, weight, bias)
    assert params["path"] == "tiled"
    assert out.shape == (batch, num_classes)
    # Tolerance accounts for bf16 MXU operands (f32 accumulation).
    assert jnp.allclose(out, ref, atol=5e-2, rtol=5e-2), "tiled-path mismatch"

    print("KERNEL_OK")
</pallas_src>

<mosaic_0001>
module attributes {stable_mosaic.version = 11 : i64} {
  func.func @_cls_head_small_kernel(%arg0: memref<8x32xf32, #tpu.memory_space<vmem>>, %arg1: memref<32x128xbf16, #tpu.memory_space<vmem>>, %arg2: memref<1x128xf32, #tpu.memory_space<vmem>>, %arg3: memref<8x128xf32, #tpu.memory_space<vmem>>) attributes {dimension_semantics = [], scalar_prefetch = 0 : i64, scratch_operands = 0 : i64, tpu.core_type = #tpu.core_type<tc>} {
    %c0 = arith.constant 0 : index
    %c0_0 = arith.constant 0 : index
    %0 = vector.load %arg0[%c0, %c0_0] : memref<8x32xf32, #tpu.memory_space<vmem>>, vector<8x32xf32>
    %1 = arith.truncf %0 : vector<8x32xf32> to vector<8x32xbf16>
    %c0_1 = arith.constant 0 : index
    %c0_2 = arith.constant 0 : index
    %2 = vector.load %arg1[%c0_1, %c0_2] : memref<32x128xbf16, #tpu.memory_space<vmem>>, vector<32x128xbf16>
    %cst = arith.constant dense<0.000000e+00> : vector<8x128xf32>
    %3 = tpu.matmul %1, %2, %cst {dimension_numbers = #tpu.dot_dimension_numbers<[1], [0], [0], [1], [0, 0, 1, 1], [], []>} : vector<8x32xbf16>, vector<32x128xbf16>, vector<8x128xf32> -> vector<8x128xf32>
    %c0_3 = arith.constant 0 : index
    %c0_4 = arith.constant 0 : index
    %4 = vector.load %arg2[%c0_3, %c0_4] : memref<1x128xf32, #tpu.memory_space<vmem>>, vector<1x128xf32>
    %5 = vector.broadcast %4 : vector<1x128xf32> to vector<8x128xf32>
    %6 = arith.addf %3, %5 : vector<8x128xf32>
    %c0_5 = arith.constant 0 : index
    %c0_6 = arith.constant 0 : index
    %7 = vector.load %arg3[%c0_5, %c0_6] : memref<8x128xf32, #tpu.memory_space<vmem>>, vector<8x128xf32>
    tpu.vector_store %arg3[%c0_5, %c0_6], %6 {strides = array<i32>} : memref<8x128xf32, #tpu.memory_space<vmem>>, vector<8x128xf32>,
    return
  }
}

</mosaic_0001>

<bundles_post_ra>
// kernel: tpu_custom_call.1
= control target key start
LH: loop header
LB: loop body
LE: loop exit
PB: predicated region body
PF: predicated region fallthrough
CT: control target
= control target key end

     0   :  { %8 = vsyncpa [#allocation3], 0  ;;  %s297_s0 = inlined_call_operand.hbm [shape: f32[8,32], index: 0, kind: input, shape index: {}]   ;;  %s298_s1 = inlined_call_operand.hbm [shape: bf16[32,128], index: 1, kind: input, shape index: {}]   ;;  %s299_s2 = inlined_call_operand.vmem [shape: f32[1,128], index: 2, kind: input, shape index: {}]   ;;  %s300_s3 = inlined_call_operand.hbm [shape: f32[8,128], index: 3, kind: output, shape index: {}]  }
   0x1   :  { %9 = vsyncpa [#allocation6], 0 }
   0x2   :  { %10 = vsyncpa [#allocation4], 0  ;;  %s224_s12 = smov [#allocation2]   ;;  %s225_s14 = smov [#allocation5]  }
   0x3   :  { %s17_s13 = sshll.u32 %s224_s12, 4  ;;  %s26_s15 = sshll.u32 %s225_s14, 4  ;;  %s18_s13 = int_to_ptr.vmem [resolvable:$true] %s17_s13  ;;  %s251_s15 = int_to_ptr.vmem [resolvable:$true] %s26_s15 }
   0x4   :  { %s152_s18 = scalar_lea.hbm %s297_s0, 128 }
   0x5   :  { %p153_p0 = scmp.ne.s32.totalorder %s297_s0, %s152_s18  ;;  %p156_p1 = scmp.lt.u32.totalorder %s152_s18, %s297_s0 }
   0x7   :  { %p158_p2 = pnand %p156_p1, %p153_p0 }
   0x9   :  { %161 = shalt.err (!%p158_p2)
}
   0xa   :  { %s162_s23 = scalar_lea.vmem %s18_s13, 128  ;;  %p167_p4 = scmp.lt.s32.totalorder %s18_s13, %s18_s13 }
   0xb   :  { %p163_p3 = scmp.ne.s32.totalorder %s18_s13, %s162_s23  ;;  %p168_p5 = scmp.lt.s32.totalorder %s162_s23, %s162_s23 }
   0xd   :  { %p169_p6 = por %p168_p5, %p167_p4 }
   0xf   :  { %p170_p7 = pnand %p169_p6, %p163_p3 }
  0x11   :  { %173 = shalt.err (!%p170_p7)
}
  0x12   :  { %20 = dma.hbm_to_vmem [thread:$0]  %s297_s0, 128, %s18_s13, [#allocation3]  }
  0x13   :  { %s174_s28 = scalar_lea.hbm %s298_s1, 256 }
  0x14   :  { %p175_p8 = scmp.ne.s32.totalorder %s298_s1, %s174_s28  ;;  %p178_p9 = scmp.lt.u32.totalorder %s174_s28, %s298_s1 }
  0x16   :  { %p180_p10 = pnand %p178_p9, %p175_p8 }
  0x18   :  { %183 = shalt.err (!%p180_p10)
}
  0x19   :  { %s184_s6 = scalar_lea.vmem %s251_s15, 256  ;;  %p189_p12 = scmp.lt.s32.totalorder %s251_s15, %s251_s15 }
  0x1a   :  { %p185_p11 = scmp.ne.s32.totalorder %s251_s15, %s184_s6  ;;  %p190_p13 = scmp.lt.s32.totalorder %s184_s6, %s184_s6 }
  0x1c   :  { %p191_p0 = por %p190_p13, %p189_p12 }
  0x1e   :  { %p192_p1 = pnand %p191_p0, %p185_p11 }
  0x20   :  { %195 = shalt.err (!%p192_p1)
}
  0x21   :  { %s226_s0 = smov 64   ;;  %s227_s7 = smov 4  }
  0x22   :  { %32 = dma.hbm_to_vmem [thread:$0]  %s298_s1, 256, %s251_s15, [#allocation6], %s226_s0, %s226_s0, %s227_s7  }
  0x23   :  { %218 = dma.done.wait [#allocation3], 128  }
  0x24   :  { %219 = vsyncadd [#allocation3], 4294967168 }
  0x25   :  { %220 = dma.done.wait [#allocation6], 256  }
  0x26   :  { %221 = vsyncadd [#allocation6], 4294967040  ;;  %v228_v0 = vmov 0.0   ;;  %vm229_vm0 = vmmov 0   ;;  %v150_v1 = vld [vmem:[#allocation5] sm:$0xff]   ;;  %v151_v2 = vld [vmem:[#allocation5 + $0x8] sm:$0xff]  }
  0x27   :  { %135 = vmatprep.subr.bf16.mxu0 %v228_v0  ;;  %139 = vmatprep.mubr.msk.bf16.mxu0 %vm229_vm0, %v228_v0  ;;  %v42_v3 = vld [vmem:[#allocation2] sm:$0xff]  ;;  %vm67_vm1 = vcmask 261120   ;;  %s230_s1 = smov [#allocation7]  }
  0x28   :  { %136 = vmatpush3.bf16.msra.mxu0 %v150_v1  ;;  %v43_v4 = vpack.c.bf16 %v42_v3, %v42_v3  ;;  %v128_v5 = vld [vmem:[%s299_s2] ss:$0 sm:$0xff]  ;;  %s118_s12 = sshll.u32 %s230_s1, 4  ;;  %s119_s12 = int_to_ptr.vmem [resolvable:$true] %s118_s12 }
  0x29   :  { %137 = vmatprep.subr.bf16.mxu0 %v228_v0  ;;  %s196_s13 = scalar_lea.vmem %s119_s12, 128  ;;  %p201_p3 = scmp.lt.s32.totalorder %s119_s12, %s119_s12 }
  0x2a   :  { %p197_p2 = scmp.ne.s32.totalorder %s119_s12, %s196_s13  ;;  %p202_p4 = scmp.lt.s32.totalorder %s196_s13, %s196_s13 }
  0x2c   :  { %138 = vmatpush3.bf16.msra.mxu0 %v151_v2  ;;  %p203_p5 = por %p202_p4, %p201_p3 }
  0x2e   :  { %p204_p6 = pnand %p203_p5, %p197_p2 }
  0x2f   :  { %140 = vmatmul.mubr.msk.bf16.vlgmr.msra.gmra.mrb[0].mxu0 %vm67_vm1, %v43_v4 }
 0x102   :  { %v105_v6 = vpop.f32.mrb[0].mxu0 }
 0x103   :  { %v106_v7 = vadd.f32 %v128_v5, %v105_v6  ;;  %v141_v8 = vpop.f32.mrb[1].mxu0 }
 0x104   :  { %v108_v9 = vpop.f32.mrb[2].mxu0 }
 0x105   :  { %111 = vst [vmem:[#allocation7] sm:$0xff] %v106_v7  ;;  %v142_v10 = vpop.f32.mrb[3].mxu0 }
 0x106   :  { %207 = shalt.err (!%p204_p6)
}
 0x107   :  { %s208_s2 = scalar_lea.hbm %s300_s3, 128 }
 0x108   :  { %p209_p7 = scmp.ne.s32.totalorder %s300_s3, %s208_s2  ;;  %p212_p8 = scmp.lt.u32.totalorder %s208_s2, %s300_s3 }
 0x10a   :  { %p214_p9 = pnand %p212_p8, %p209_p7 }
 0x10c   :  { %217 = shalt.err (!%p214_p9)
}
 0x10d   :  { %121 = dma.vmem_to_hbm [thread:$0]  %s119_s12, 128, %s300_s3, [#allocation4]  }
 0x10e   :  { %222 = dma.done.wait [#allocation4], 128  }
 0x10f   :  { %223 = vsyncadd [#allocation4], 4294967168 }
 0x110   :  { %125 = vsyncpa [#allocation3], 1 }
 0x111   :  { %126 = vsyncpa [#allocation6], 1 }
 0x112   :  { %127 = vsyncpa [#allocation4], 1 }

</bundles_post_ra>
